<compile_context>
chip_gen: v7x
topology: tpu7x:2x2x1
jax: 0.10.0
libtpu: 0.0.40
codegen_flags: <defaults>
</compile_context>

<pallas_src>
import functools

import jax
import jax.numpy as jnp
from jax.experimental import pallas as pl
from jax.experimental.pallas import tpu as pltpu


def _round_up(x: int, m: int) -> int:
    return (x + m - 1) // m * m


def _projection_kernel(x_ref, w_ref, b_ref, o_ref):
    """o = x @ w + b for one (TM, D) output tile; bf16 inputs, f32 accumulate."""
    acc = jnp.dot(x_ref[...], w_ref[...], preferred_element_type=jnp.float32)
    o_ref[...] = (acc + b_ref[...].astype(jnp.float32)).astype(o_ref.dtype)


@functools.partial(jax.jit, static_argnames=("tm",))
def text_encoder_projection(hidden_states, weight_t, bias, *, tm=256):
    """Pallas implementation of `self.projection(hidden_states)`.

    Args:
      hidden_states: [B, S, H]  (stand-in for transformer.last_hidden_state)
      weight_t:      [H, D]     (transpose of PyTorch nn.Linear weight [D, H])
      bias:          [D]
      tm:            output rows computed per grid step.
    Returns:
      [B, S, D] embeddings, same dtype as hidden_states.
    """
    B, S, H = hidden_states.shape
    D = weight_t.shape[1]
    M = B * S
    out_dtype = hidden_states.dtype
    itemsize = jnp.dtype(out_dtype).itemsize

    # ---- pad to TPU-friendly shapes -------------------------------------
    Hp = _round_up(H, 128)            # MXU contraction edge / lane-dense loads
    Dp = _round_up(D, 128)            # lane-dense stores (no masked vst)
    tm_eff = min(tm, _round_up(M, 8))
    Mp = _round_up(M, tm_eff)

    x2d = hidden_states.reshape(M, H)
    if (Mp, Hp) != (M, H):
        x2d = jnp.pad(x2d, ((0, Mp - M), (0, Hp - H)))
    w2d = weight_t
    if (Hp, Dp) != (H, D):
        w2d = jnp.pad(w2d, ((0, Hp - H), (0, Dp - D)))
    b1d = bias if Dp == D else jnp.pad(bias, ((0, Dp - D),))
    b2d = b1d.astype(jnp.float32).reshape(1, Dp)

    # bf16 MXU inputs, f32 accumulation (frozen-encoder activations tolerate it).
    x_bf = x2d.astype(jnp.bfloat16)
    w_bf = w2d.astype(jnp.bfloat16)

    grid = (Mp // tm_eff,)

    # VMEM budget: double-buffered x + output tiles, resident weight + bias.
    vmem_bytes = (2 * tm_eff * Hp * 2           # x tiles (bf16)
                  + 2 * tm_eff * Dp * itemsize  # output tiles
                  + Hp * Dp * 2                 # resident weight (bf16)
                  + 2 * Dp * 4)                 # resident bias (f32)
    vmem_limit = int(min(max(4 * vmem_bytes, 16 << 20), 32 << 20))

    cost = pl.CostEstimate(
        flops=2 * Mp * Hp * Dp,
        transcendentals=0,
        bytes_accessed=(Mp * Hp * 2 + Hp * Dp * 2 + Dp * 4 + Mp * Dp * itemsize),
    )

    out2d = pl.pallas_call(
        _projection_kernel,
        out_shape=jax.ShapeDtypeStruct((Mp, Dp), out_dtype),
        grid_spec=pltpu.PrefetchScalarGridSpec(
            num_scalar_prefetch=0,
            grid=grid,
            in_specs=[
                pl.BlockSpec((tm_eff, Hp), lambda i: (i, 0)),  # x: tiled along M
                pl.BlockSpec((Hp, Dp), lambda i: (0, 0)),      # weight: resident
                pl.BlockSpec((1, Dp), lambda i: (0, 0)),       # bias: resident
            ],
            out_specs=pl.BlockSpec((tm_eff, Dp), lambda i: (i, 0)),
        ),
        compiler_params=pltpu.CompilerParams(
            dimension_semantics=("parallel",),   # v7x: shard M across 2 TCs
            vmem_limit_bytes=vmem_limit,
        ),
        cost_estimate=cost,
    )(x_bf, w_bf, b2d)

    return out2d[:M, :D].reshape(B, S, D)


if __name__ == "__main__":
    # Shapes implied by the module defaults: bert-base hidden_size = 768,
    # output_dim = 512, max_text_length = 200; a small batch of 2 texts.
    B, S, H, D = 2, 200, 768, 512

    key = jax.random.PRNGKey(0)
    k_x, k_w, k_b = jax.random.split(key, 3)

    # TODO(synk): tokenizer + pretrained AutoModel forward have no Pallas
    # equivalent; `hidden_states` below stands in for last_hidden_state.
    hidden_states = jax.random.normal(k_x, (B, S, H), dtype=jnp.float32)

    # nn.Linear(H, D) parameters: weight [D, H], bias [D].
    weight = jax.random.normal(k_w, (D, H), dtype=jnp.float32) * 0.02
    bias = jax.random.normal(k_b, (D,), dtype=jnp.float32) * 0.02
    weight_t = weight.T  # [H, D] layout for the kernel

    out = text_encoder_projection(hidden_states, weight_t, bias, tm=128)
    out = jax.block_until_ready(out)
    assert out.shape == (B, S, D)

    # Reference with the same bf16-input / f32-accumulation numerics.
    x_bf = hidden_states.astype(jnp.bfloat16)
    w_bf = weight_t.astype(jnp.bfloat16)
    ref_bf = jnp.einsum("bsh,hd->bsd", x_bf, w_bf,
                        preferred_element_type=jnp.float32) + bias
    assert jnp.allclose(out, ref_bf, atol=1e-2, rtol=1e-2)

    # Looser check against the full-f32 (PyTorch-equivalent) reference.
    ref_f32 = hidden_states @ weight_t + bias
    assert jnp.allclose(out, ref_f32, atol=5e-2, rtol=5e-2)

    print("KERNEL_OK")
</pallas_src>

<mosaic_0001>
module attributes {stable_mosaic.version = 11 : i64} {
  func.func @_projection_kernel(%arg0: i32, %arg1: memref<128x768xbf16, #tpu.memory_space<vmem>>, %arg2: memref<768x512xbf16, #tpu.memory_space<vmem>>, %arg3: memref<1x512xf32, #tpu.memory_space<vmem>>, %arg4: memref<128x512xf32, #tpu.memory_space<vmem>>) attributes {dimension_semantics = [#tpu.dimension_semantics<parallel>], iteration_bounds = array<i64: 4>, scalar_prefetch = 0 : i64, scratch_operands = 0 : i64, tpu.core_type = #tpu.core_type<tc>, window_params = [{transform_indices = @transform_0, window_bounds = array<i64: 128, 768>}, {pipeline_mode = #tpu.pipeline_mode<synchronous>, transform_indices = @transform_1, window_bounds = array<i64: 768, 512>}, {pipeline_mode = #tpu.pipeline_mode<synchronous>, transform_indices = @transform_2, window_bounds = array<i64: 1, 512>}, {transform_indices = @transform_3, window_bounds = array<i64: 128, 512>}]} {
    %c0 = arith.constant 0 : index
    %c0_0 = arith.constant 0 : index
    %0 = vector.load %arg1[%c0, %c0_0] : memref<128x768xbf16, #tpu.memory_space<vmem>>, vector<128x768xbf16>
    %c0_1 = arith.constant 0 : index
    %c0_2 = arith.constant 0 : index
    %1 = vector.load %arg2[%c0_1, %c0_2] : memref<768x512xbf16, #tpu.memory_space<vmem>>, vector<768x512xbf16>
    %cst = arith.constant dense<0.000000e+00> : vector<128x512xf32>
    %2 = tpu.matmul %0, %1, %cst {dimension_numbers = #tpu.dot_dimension_numbers<[1], [0], [0], [1], [0, 0, 1, 1], [], []>} : vector<128x768xbf16>, vector<768x512xbf16>, vector<128x512xf32> -> vector<128x512xf32>
    %c0_3 = arith.constant 0 : index
    %c0_4 = arith.constant 0 : index
    %3 = vector.load %arg3[%c0_3, %c0_4] : memref<1x512xf32, #tpu.memory_space<vmem>>, vector<1x512xf32>
    %4 = vector.broadcast %3 : vector<1x512xf32> to vector<128x512xf32>
    %5 = arith.addf %2, %4 : vector<128x512xf32>
    %c0_5 = arith.constant 0 : index
    %c0_6 = arith.constant 0 : index
    %6 = vector.load %arg4[%c0_5, %c0_6] : memref<128x512xf32, #tpu.memory_space<vmem>>, vector<128x512xf32>
    tpu.vector_store %arg4[%c0_5, %c0_6], %5 {strides = array<i32>} : memref<128x512xf32, #tpu.memory_space<vmem>>, vector<128x512xf32>,
    return
  }
  func.func @transform_0(%arg0: i32) -> (i32, i32) {
    %c0_i32 = arith.constant 0 : i32
    %c0_i32_0 = arith.constant 0 : i32
    return %arg0, %c0_i32 : i32, i32
  }
  func.func @transform_1(%arg0: i32) -> (i32, i32) {
    %c0_i32 = arith.constant 0 : i32
    %c0_i32_0 = arith.constant 0 : i32
    %c0_i32_1 = arith.constant 0 : i32
    return %c0_i32, %c0_i32_0 : i32, i32
  }
  func.func @transform_2(%arg0: i32) -> (i32, i32) {
    %c0_i32 = arith.constant 0 : i32
    %c0_i32_0 = arith.constant 0 : i32
    %c0_i32_1 = arith.constant 0 : i32
    return %c0_i32, %c0_i32_0 : i32, i32
  }
  func.func @transform_3(%arg0: i32) -> (i32, i32) {
    %c0_i32 = arith.constant 0 : i32
    %c0_i32_0 = arith.constant 0 : i32
    return %arg0, %c0_i32 : i32, i32
  }
}

</mosaic_0001>

<bundles_post_ra>
// kernel: text_encoder_projection.1
= control target key start
LH: loop header
LB: loop body
LE: loop exit
PB: predicated region body
PF: predicated region fallthrough
CT: control target
= control target key end

     0   :  { %s3283_s12 = smov 0   ;;  %s4073_s0 = inlined_call_operand.vmem [shape: bf16[512,768], index: 0, kind: input, shape index: {}]   ;;  %s4074_s1 = inlined_call_operand.vmem [shape: bf16[768,512], index: 1, kind: input, shape index: {}]   ;;  %s4075_s2 = inlined_call_operand.vmem [shape: f32[1,512], index: 2, kind: input, shape index: {}]   ;;  %s4076_s3 = inlined_call_operand.vmem [shape: f32[512,512], index: 3, kind: output, shape index: {}]  }
   0x1 LB: > { %s2441_s13 = sadd.s32 4294967295, %s3261_s12   ;;  %p2445_p0 = scmp.ge.s32.totalorder %s3261_s12, 1  ;;  %s3261_s12 = sphi %s3283_s12, %s13_s12  }
   0x2   : > { %p139_p1 = scmp.lt.s32.totalorder %s3261_s12, 5 }
   0x4   : > { %p140_p2 = pnand %p2445_p0, %p139_p1 }
   0x5   : > { %v2895_v0 = vld [vmem:[%s4074_s1 + $0x4] ss:$16 sps:$4 sm:$0xff] (!%p140_p2)   ;;  %v2897_v1 = vld [vmem:[%s4074_s1 + $0xc] ss:$16 sps:$4 sm:$0xff] (!%p140_p2)   ;;  %v2899_v2 = vld [vmem:[%s4074_s1] ss:$16 sps:$4 sm:$0xff] (!%p140_p2)  }
   0x6   : > { %143 = sbr.rel (%p140_p2) target bundleno = 472 (0x1d8), region = 32  ;;  %1641 = vmatprep.subr.bf16.mxu0 (!%p140_p2), %v2895_v0  ;;  %v2900_v3 = vld [vmem:[%s4074_s1 + $0x8] ss:$16 sps:$4 sm:$0xff] (!%p140_p2)   ;;  %1980 = vmatprep.subr.bf16.mxu1 (!%p140_p2), %v2897_v1  ;;  %v2901_v4 = vld [vmem:[%s4074_s1 + $0x24] ss:$16 sps:$4 sm:$0xff] (!%p140_p2)   ;;  %s2446_s24 = sshll.u32 (!%p140_p2), %s2441_s13, 4 }
   0x7   : > { %1642 = vmatpush1.bf16.msra.mxu0 (!%p140_p2), %v2899_v2  ;;  %1981 = vmatpush1.bf16.msra.mxu1 (!%p140_p2), %v2900_v3  ;;  %v2903_v5 = vld [vmem:[%s4074_s1 + $0x2c] ss:$16 sps:$4 sm:$0xff] (!%p140_p2)   ;;  %v2905_v6 = vld [vmem:[%s4074_s1 + $0x20] ss:$16 sps:$4 sm:$0xff] (!%p140_p2)   ;;  %v2906_v7 = vld [vmem:[%s4074_s1 + $0x28] ss:$16 sps:$4 sm:$0xff] (!%p140_p2)  }
   0x8   : > { %1643 = vmatprep.subr.bf16.mxu0 (!%p140_p2), %v2901_v4  ;;  %1982 = vmatprep.subr.bf16.mxu1 (!%p140_p2), %v2903_v5  ;;  %v2907_v8 = vld [vmem:[%s4074_s1 + $0x44] ss:$16 sps:$4 sm:$0xff] (!%p140_p2)   ;;  %v2909_v9 = vld [vmem:[%s4074_s1 + $0x4c] ss:$16 sps:$4 sm:$0xff] (!%p140_p2)   ;;  %v2911_v10 = vld [vmem:[%s4074_s1 + $0x40] ss:$16 sps:$4 sm:$0xff] (!%p140_p2)  }
   0x9   : > { %v2912_v11 = vld [vmem:[%s4074_s1 + $0x48] ss:$16 sps:$4 sm:$0xff] (!%p140_p2)   ;;  %v2913_v12 = vld [vmem:[%s4074_s1 + $0x64] ss:$16 sps:$4 sm:$0xff] (!%p140_p2)   ;;  %v2915_v13 = vld [vmem:[%s4074_s1 + $0x6c] ss:$16 sps:$4 sm:$0xff] (!%p140_p2)  }
   0xa   : > { %v2917_v14 = vld [vmem:[%s4074_s1 + $0x60] ss:$16 sps:$4 sm:$0xff] (!%p140_p2)   ;;  %v2918_v15 = vld [vmem:[%s4074_s1 + $0x68] ss:$16 sps:$4 sm:$0xff] (!%p140_p2)   ;;  %v2919_v16 = vld [vmem:[%s4074_s1 + $0x84] ss:$16 sps:$4 sm:$0xff] (!%p140_p2)  }
   0xb   : > { %1644 = vmatpush1.bf16.msra.mxu0 (!%p140_p2), %v2905_v6  ;;  %1983 = vmatpush1.bf16.msra.mxu1 (!%p140_p2), %v2906_v7  ;;  %v2921_v17 = vld [vmem:[%s4074_s1 + $0x8c] ss:$16 sps:$4 sm:$0xff] (!%p140_p2)   ;;  %v2923_v18 = vld [vmem:[%s4074_s1 + $0x80] ss:$16 sps:$4 sm:$0xff] (!%p140_p2)   ;;  %v2924_v19 = vld [vmem:[%s4074_s1 + $0x88] ss:$16 sps:$4 sm:$0xff] (!%p140_p2)  }
   0xc   : > { %1645 = vmatprep.subr.bf16.mxu0 (!%p140_p2), %v2907_v8  ;;  %1984 = vmatprep.subr.bf16.mxu1 (!%p140_p2), %v2909_v9  ;;  %v2925_v20 = vld [vmem:[%s4074_s1 + $0xa4] ss:$16 sps:$4 sm:$0xff] (!%p140_p2)   ;;  %v2927_v21 = vld [vmem:[%s4074_s1 + $0xac] ss:$16 sps:$4 sm:$0xff] (!%p140_p2)   ;;  %v2929_v22 = vld [vmem:[%s4074_s1 + $0xa0] ss:$16 sps:$4 sm:$0xff] (!%p140_p2)  }
   0xd   : > { %v2930_v23 = vld [vmem:[%s4074_s1 + $0xa8] ss:$16 sps:$4 sm:$0xff]   ;;  %v2931_v24 = vld [vmem:[%s4074_s1 + $0xc4] ss:$16 sps:$4 sm:$0xff]   ;;  %v2933_v25 = vld [vmem:[%s4074_s1 + $0xcc] ss:$16 sps:$4 sm:$0xff]  }
   0xe   : > { %v2935_v26 = vld [vmem:[%s4074_s1 + $0xc0] ss:$16 sps:$4 sm:$0xff]   ;;  %v2936_v27 = vld [vmem:[%s4074_s1 + $0xc8] ss:$16 sps:$4 sm:$0xff]   ;;  %v2937_v28 = vld [vmem:[%s4074_s1 + $0xe4] ss:$16 sps:$4 sm:$0xff]  }
   0xf   : > { %1646 = vmatpush1.bf16.msra.mxu0 %v2911_v10  ;;  %1985 = vmatpush1.bf16.msra.mxu1 %v2912_v11  ;;  %v2939_v29 = vld [vmem:[%s4074_s1 + $0xec] ss:$16 sps:$4 sm:$0xff]   ;;  %v2941_v30 = vld [vmem:[%s4074_s1 + $0xe0] ss:$16 sps:$4 sm:$0xff]   ;;  %v2942_v31 = vld [vmem:[%s4074_s1 + $0xe8] ss:$16 sps:$4 sm:$0xff]  }
  0x10   : > { %1647 = vmatprep.subr.bf16.mxu0 %v2913_v12  ;;  %1986 = vmatprep.subr.bf16.mxu1 %v2915_v13  ;;  %v2943_v32 = vld [vmem:[%s4074_s1 + $0x104] ss:$16 sps:$4 sm:$0xff]   ;;  %p166_p3 = scmp.lt.s32.totalorder %s2446_s24, 63  ;;  %v2945_v33 = vld [vmem:[%s4074_s1 + $0x10c] ss:$16 sps:$4 sm:$0xff]  }
  0x11   : > { %v2947_v34 = vld [vmem:[%s4074_s1 + $0x100] ss:$16 sps:$4 sm:$0xff]   ;;  %v2948_v35 = vld [vmem:[%s4074_s1 + $0x108] ss:$16 sps:$4 sm:$0xff]   ;;  %v2949_v36 = vld [vmem:[%s4074_s1 + $0x124] ss:$16 sps:$4 sm:$0xff]  }
  0x12   : > { %s4078_s24 = smov (!%p166_p3, %s2446_s24), 63  ;;  %v2951_v37 = vld [vmem:[%s4074_s1 + $0x12c] ss:$16 sps:$4 sm:$0xff]   ;;  %v2953_v38 = vld [vmem:[%s4074_s1 + $0x120] ss:$16 sps:$4 sm:$0xff]  }
  0x13   : > { %1648 = vmatpush1.bf16.msra.mxu0 %v2917_v14  ;;  %1987 = vmatpush1.bf16.msra.mxu1 %v2918_v15  ;;  %v2954_v39 = vld [vmem:[%s4074_s1 + $0x128] ss:$16 sps:$4 sm:$0xff]   ;;  %v2955_v40 = vld [vmem:[%s4074_s1 + $0x144] ss:$16 sps:$4 sm:$0xff]   ;;  %s2886_s21 = smul.u32 24, %s4078_s24  ;;  %s2693_s16 = sshll.u32 %s4078_s24, 5 }
  0x14   : > { %1649 = vmatprep.subr.bf16.mxu0 %v2919_v16  ;;  %1988 = vmatprep.subr.bf16.mxu1 %v2921_v17  ;;  %v2957_v41 = vld [vmem:[%s4074_s1 + $0x14c] ss:$16 sps:$4 sm:$0xff]   ;;  %v2959_v42 = vld [vmem:[%s4074_s1 + $0x140] ss:$16 sps:$4 sm:$0xff]   ;;  %v2960_v43 = vld [vmem:[%s4074_s1 + $0x148] ss:$16 sps:$4 sm:$0xff]   ;;  %s3940_s18 = scalar_lea.vmem %s4076_s3, %s2693_s16 }
  0x15   : > { %v2961_v44 = vld [vmem:[%s4074_s1 + $0x164] ss:$16 sps:$4 sm:$0xff]   ;;  %s3434_s13 = scalar_lea.vmem %s4073_s0, %s2886_s21  ;;  %v2963_v45 = vld [vmem:[%s4074_s1 + $0x16c] ss:$16 sps:$4 sm:$0xff]   ;;  %v2965_v46 = vld [vmem:[%s4074_s1 + $0x160] ss:$16 sps:$4 sm:$0xff]  }
  0x16   : > { %v2966_v47 = vld [vmem:[%s4074_s1 + $0x168] ss:$16 sps:$4 sm:$0xff]   ;;  %v2993_v48 = vld [vmem:[%s3434_s13 + $0x4] ss:$24 sps:$4 sm:$0xff]   ;;  %v2971_v51 = vld [vmem:[%s4074_s1 + $0x180] ss:$16 sps:$4 sm:$0xff]  }
  0x17   : > { %1650 = vmatpush1.bf16.msra.mxu0 %v2923_v18  ;;  %1989 = vmatpush1.bf16.msra.mxu1 %v2924_v19  ;;  %v2967_v49 = vld [vmem:[%s4074_s1 + $0x184] ss:$16 sps:$4 sm:$0xff]   ;;  %v2969_v50 = vld [vmem:[%s4074_s1 + $0x18c] ss:$16 sps:$4 sm:$0xff]   ;;  %v2972_v52 = vld [vmem:[%s4074_s1 + $0x188] ss:$16 sps:$4 sm:$0xff]  }
  0x18   : > { %1651 = vmatprep.subr.bf16.mxu0 %v2925_v20  ;;  %1990 = vmatprep.subr.bf16.mxu1 %v2927_v21  ;;  %v2973_v53 = vld [vmem:[%s4074_s1 + $0x1a4] ss:$16 sps:$4 sm:$0xff]   ;;  %v2975_v54 = vld [vmem:[%s4074_s1 + $0x1ac] ss:$16 sps:$4 sm:$0xff]   ;;  %v2977_v55 = vld [vmem:[%s4074_s1 + $0x1a0] ss:$16 sps:$4 sm:$0xff]  }
  0x19   : > { %1673 = vmatprep.mubr.bf16.mxu0 %v2993_v48  ;;  %2012 = vmatprep.mubr.bf16.mxu1 %v2993_v48  ;;  %v2978_v56 = vld [vmem:[%s4074_s1 + $0x1a8] ss:$16 sps:$4 sm:$0xff]   ;;  %v2979_v57 = vld [vmem:[%s4074_s1 + $0x1c4] ss:$16 sps:$4 sm:$0xff]   ;;  %v2981_v58 = vld [vmem:[%s4074_s1 + $0x1cc] ss:$16 sps:$4 sm:$0xff]  }
  0x1a   : > { %v2983_v59 = vld [vmem:[%s4074_s1 + $0x1c0] ss:$16 sps:$4 sm:$0xff]   ;;  %v2984_v60 = vld [vmem:[%s4074_s1 + $0x1c8] ss:$16 sps:$4 sm:$0xff]   ;;  %v2985_v61 = vld [vmem:[%s4074_s1 + $0x1e4] ss:$16 sps:$4 sm:$0xff]  }
  0x1b   : > { %1652 = vmatpush1.bf16.msra.mxu0 %v2929_v22  ;;  %1991 = vmatpush1.bf16.msra.mxu1 %v2930_v23  ;;  %v2987_v62 = vld [vmem:[%s4074_s1 + $0x1ec] ss:$16 sps:$4 sm:$0xff]   ;;  %v2989_v63 = vld [vmem:[%s4074_s1 + $0x1e0] ss:$16 sps:$4 sm:$0xff]   ;;  %v2990_v0 = vld [vmem:[%s4074_s1 + $0x1e8] ss:$16 sps:$4 sm:$0xff]  }
  0x1c   : > { %1653 = vmatprep.subr.bf16.mxu0 %v2931_v24  ;;  %1992 = vmatprep.subr.bf16.mxu1 %v2933_v25  ;;  %v2996_v1 = vld [vmem:[%s4074_s1 + $0x204] ss:$16 sps:$4 sm:$0xff]   ;;  %v2999_v2 = vld [vmem:[%s4074_s1 + $0x20c] ss:$16 sps:$4 sm:$0xff]   ;;  %v2991_v3 = vld [vmem:[%s3434_s13] ss:$24 sps:$4 sm:$0xff]  }
  0x1d   : > { %v2994_v4 = vld [vmem:[%s4074_s1 + $0x200] ss:$16 sps:$4 sm:$0xff]   ;;  %v2997_v5 = vld [vmem:[%s4074_s1 + $0x208] ss:$16 sps:$4 sm:$0xff]   ;;  %v3002_v6 = vld [vmem:[%s4074_s1 + $0x224] ss:$16 sps:$4 sm:$0xff]  }
  0x1e   : > { %v3005_v7 = vld [vmem:[%s4074_s1 + $0x22c] ss:$16 sps:$4 sm:$0xff]   ;;  %v3000_v9 = vld [vmem:[%s4074_s1 + $0x220] ss:$16 sps:$4 sm:$0xff]   ;;  %v3003_v10 = vld [vmem:[%s4074_s1 + $0x228] ss:$16 sps:$4 sm:$0xff]  }
  0x1f   : > { %1654 = vmatpush1.bf16.msra.mxu0 %v2935_v26  ;;  %1993 = vmatpush1.bf16.msra.mxu1 %v2936_v27  ;;  %v3006_v8 = vld [vmem:[%s3434_s13 + $0x34] ss:$24 sps:$4 sm:$0xff]   ;;  %v3008_v13 = vld [vmem:[%s3434_s13 + $0x30] ss:$24 sps:$4 sm:$0xff]   ;;  %v3021_v18 = vld [vmem:[%s3434_s13 + $0x64] ss:$24 sps:$4 sm:$0xff]  }
  0x20   : > { %1655 = vmatprep.subr.bf16.mxu0 %v2937_v28  ;;  %1994 = vmatprep.subr.bf16.mxu1 %v2939_v29  ;;  %v3011_v11 = vld [vmem:[%s4074_s1 + $0x244] ss:$16 sps:$4 sm:$0xff]   ;;  %v3014_v12 = vld [vmem:[%s4074_s1 + $0x24c] ss:$16 sps:$4 sm:$0xff]   ;;  %v3009_v14 = vld [vmem:[%s4074_s1 + $0x240] ss:$16 sps:$4 sm:$0xff]  }
  0x21   : > { %v3012_v15 = vld [vmem:[%s4074_s1 + $0x248] ss:$16 sps:$4 sm:$0xff]   ;;  %v3017_v16 = vld [vmem:[%s4074_s1 + $0x264] ss:$16 sps:$4 sm:$0xff]   ;;  %v3020_v17 = vld [vmem:[%s4074_s1 + $0x26c] ss:$16 sps:$4 sm:$0xff]  }
  0x22   : > { %v3015_v19 = vld [vmem:[%s4074_s1 + $0x260] ss:$16 sps:$4 sm:$0xff]   ;;  %v3018_v20 = vld [vmem:[%s4074_s1 + $0x268] ss:$16 sps:$4 sm:$0xff]   ;;  %v3026_v21 = vld [vmem:[%s4074_s1 + $0x284] ss:$16 sps:$4 sm:$0xff]  }
  0x23   : > { %1656 = vmatpush1.bf16.msra.mxu0 %v2941_v30  ;;  %1995 = vmatpush1.bf16.msra.mxu1 %v2942_v31  ;;  %v3029_v22 = vld [vmem:[%s4074_s1 + $0x28c] ss:$16 sps:$4 sm:$0xff]   ;;  %v3023_v23 = vld [vmem:[%s3434_s13 + $0x60] ss:$24 sps:$4 sm:$0xff]   ;;  %v3032_v26 = vld [vmem:[%s4074_s1 + $0x2a4] ss:$16 sps:$4 sm:$0xff]  }
  0x24   : > { %1657 = vmatprep.subr.bf16.mxu0 %v2943_v32  ;;  %1996 = vmatprep.subr.bf16.mxu1 %v2945_v33  ;;  %v3024_v24 = vld [vmem:[%s4074_s1 + $0x280] ss:$16 sps:$4 sm:$0xff]   ;;  %v3027_v25 = vld [vmem:[%s4074_s1 + $0x288] ss:$16 sps:$4 sm:$0xff]   ;;  %v3035_v27 = vld [vmem:[%s4074_s1 + $0x2ac] ss:$16 sps:$4 sm:$0xff]  }
  0x25   : > { %v3036_v28 = vld [vmem:[%s3434_s13 + $0x94] ss:$24 sps:$4 sm:$0xff]   ;;  %v3030_v29 = vld [vmem:[%s4074_s1 + $0x2a0] ss:$16 sps:$4 sm:$0xff]   ;;  %v3033_v30 = vld [vmem:[%s4074_s1 + $0x2a8] ss:$16 sps:$4 sm:$0xff]  }
  0x26   : > { %v3041_v31 = vld [vmem:[%s4074_s1 + $0x2c4] ss:$16 sps:$4 sm:$0xff]   ;;  %v3044_v32 = vld [vmem:[%s4074_s1 + $0x2cc] ss:$16 sps:$4 sm:$0xff]   ;;  %v3038_v33 = vld [vmem:[%s3434_s13 + $0x90] ss:$24 sps:$4 sm:$0xff]  }
  0x27   : > { %1658 = vmatpush1.bf16.msra.mxu0 %v2947_v34  ;;  %1997 = vmatpush1.bf16.msra.mxu1 %v2948_v35  ;;  %v3039_v34 = vld [vmem:[%s4074_s1 + $0x2c0] ss:$16 sps:$4 sm:$0xff]   ;;  %v3042_v35 = vld [vmem:[%s4074_s1 + $0x2c8] ss:$16 sps:$4 sm:$0xff]   ;;  %v3066_v48 = vld [vmem:[%s3434_s13 + $0xf4] ss:$24 sps:$4 sm:$0xff]  }
  0x28   : > { %1659 = vmatprep.subr.bf16.mxu0 %v2949_v36  ;;  %1998 = vmatprep.subr.bf16.mxu1 %v2951_v37  ;;  %v3047_v36 = vld [vmem:[%s4074_s1 + $0x2e4] ss:$16 sps:$4 sm:$0xff]   ;;  %v3050_v37 = vld [vmem:[%s4074_s1 + $0x2ec] ss:$16 sps:$4 sm:$0xff]  }
  0x2b   : > { %1660 = vmatpush1.bf16.msra.mxu0 %v2953_v38  ;;  %1999 = vmatpush1.bf16.msra.mxu1 %v2954_v39  ;;  %v3051_v38 = vld [vmem:[%s3434_s13 + $0xc4] ss:$24 sps:$4 sm:$0xff]   ;;  %v3045_v39 = vld [vmem:[%s4074_s1 + $0x2e0] ss:$16 sps:$4 sm:$0xff]  }
  0x2c   : > { %1661 = vmatprep.subr.bf16.mxu0 %v2955_v40  ;;  %2000 = vmatprep.subr.bf16.mxu1 %v2957_v41  ;;  %v3048_v40 = vld [vmem:[%s4074_s1 + $0x2e8] ss:$16 sps:$4 sm:$0xff]   ;;  %v3056_v41 = vld [vmem:[%s4074_s1 + $0x304] ss:$16 sps:$4 sm:$0xff]  }
  0x2f   : > { %1662 = vmatpush1.bf16.msra.mxu0 %v2959_v42  ;;  %2001 = vmatpush1.bf16.msra.mxu1 %v2960_v43  ;;  %v3059_v42 = vld [vmem:[%s4074_s1 + $0x30c] ss:$16 sps:$4 sm:$0xff]   ;;  %v3053_v43 = vld [vmem:[%s3434_s13 + $0xc0] ss:$24 sps:$4 sm:$0xff]  }
  0x30   : > { %1663 = vmatprep.subr.bf16.mxu0 %v2961_v44  ;;  %2002 = vmatprep.subr.bf16.mxu1 %v2963_v45  ;;  %v3054_v44 = vld [vmem:[%s4074_s1 + $0x300] ss:$16 sps:$4 sm:$0xff]   ;;  %v3057_v45 = vld [vmem:[%s4074_s1 + $0x308] ss:$16 sps:$4 sm:$0xff]  }
  0x33   : > { %1664 = vmatpush1.bf16.msra.mxu0 %v2965_v46  ;;  %2003 = vmatpush1.bf16.msra.mxu1 %v2966_v47  ;;  %v3062_v46 = vld [vmem:[%s4074_s1 + $0x324] ss:$16 sps:$4 sm:$0xff]   ;;  %v3065_v47 = vld [vmem:[%s4074_s1 + $0x32c] ss:$16 sps:$4 sm:$0xff]  }
  0x34   : > { %1665 = vmatprep.subr.bf16.mxu0 %v2967_v49  ;;  %2004 = vmatprep.subr.bf16.mxu1 %v2969_v50  ;;  %v3060_v49 = vld [vmem:[%s4074_s1 + $0x320] ss:$16 sps:$4 sm:$0xff]   ;;  %v3063_v50 = vld [vmem:[%s4074_s1 + $0x328] ss:$16 sps:$4 sm:$0xff]  }
  0x37   : > { %1666 = vmatpush1.bf16.msra.mxu0 %v2971_v51  ;;  %2005 = vmatpush1.bf16.msra.mxu1 %v2972_v52  ;;  %v3071_v51 = vld [vmem:[%s4074_s1 + $0x344] ss:$16 sps:$4 sm:$0xff]   ;;  %v3074_v52 = vld [vmem:[%s4074_s1 + $0x34c] ss:$16 sps:$4 sm:$0xff]  }
  0x38   : > { %1667 = vmatprep.subr.bf16.mxu0 %v2973_v53  ;;  %2006 = vmatprep.subr.bf16.mxu1 %v2975_v54  ;;  %v3068_v53 = vld [vmem:[%s3434_s13 + $0xf0] ss:$24 sps:$4 sm:$0xff]  }
  0x39   : > { %v3069_v54 = vld [vmem:[%s4074_s1 + $0x340] ss:$16 sps:$4 sm:$0xff]  }
  0x3b   : > { %1668 = vmatpush1.bf16.msra.mxu0 %v2977_v55  ;;  %2007 = vmatpush1.bf16.msra.mxu1 %v2978_v56  ;;  %v3072_v55 = vld [vmem:[%s4074_s1 + $0x348] ss:$16 sps:$4 sm:$0xff]   ;;  %v3077_v56 = vld [vmem:[%s4074_s1 + $0x364] ss:$16 sps:$4 sm:$0xff]  }
  0x3c   : > { %1669 = vmatprep.subr.bf16.mxu0 %v2979_v57  ;;  %2008 = vmatprep.subr.bf16.mxu1 %v2981_v58  ;;  %v3080_v57 = vld [vmem:[%s4074_s1 + $0x36c] ss:$16 sps:$4 sm:$0xff]  }
  0x3d   : > { %v3081_v58 = vld [vmem:[%s3434_s13 + $0x124] ss:$24 sps:$4 sm:$0xff]  }
  0x3f   : > { %1670 = vmatpush1.bf16.msra.mxu0 %v2983_v59  ;;  %2009 = vmatpush1.bf16.msra.mxu1 %v2984_v60  ;;  %v3075_v59 = vld [vmem:[%s4074_s1 + $0x360] ss:$16 sps:$4 sm:$0xff]   ;;  %v3078_v60 = vld [vmem:[%s4074_s1 + $0x368] ss:$16 sps:$4 sm:$0xff]  }
  0x40   : > { %1671 = vmatprep.subr.bf16.mxu0 %v2985_v61  ;;  %2010 = vmatprep.subr.bf16.mxu1 %v2987_v62  ;;  %v3086_v61 = vld [vmem:[%s4074_s1 + $0x384] ss:$16 sps:$4 sm:$0xff]   ;;  %v3089_v62 = vld [vmem:[%s4074_s1 + $0x38c] ss:$16 sps:$4 sm:$0xff]  }
  0x43   : > { %1672 = vmatpush1.bf16.msra.mxu0 %v2989_v63  ;;  %2011 = vmatpush1.bf16.msra.mxu1 %v2990_v0  ;;  %v3083_v63 = vld [vmem:[%s3434_s13 + $0x120] ss:$24 sps:$4 sm:$0xff]  }
  0x44   : > { %1754 = vmatprep.subr.bf16.mxu0 %v2996_v1  ;;  %2093 = vmatprep.subr.bf16.mxu1 %v2999_v2  ;;  %v3084_v0 = vld [vmem:[%s4074_s1 + $0x380] ss:$16 sps:$4 sm:$0xff]   ;;  %v3087_v1 = vld [vmem:[%s4074_s1 + $0x388] ss:$16 sps:$4 sm:$0xff]   ;;  %v3092_v2 = vld [vmem:[%s4074_s1 + $0x3a4] ss:$16 sps:$4 sm:$0xff]  }
  0x46   : > { %1674 = vmatmul.mubr.bf16.vlgmr.msra.gmra.mrb[0].mxu0 %v2991_v3  ;;  %2013 = vmatmul.mubr.bf16.vlgmr.msra.gmra.mrb[0].mxu1 %v2991_v3  ;;  %v3095_v3 = vld [vmem:[%s4074_s1 + $0x3ac] ss:$16 sps:$4 sm:$0xff]  }
  0x47   : > { %1755 = vmatpush1.bf16.msra.mxu0 %v2994_v4  ;;  %2094 = vmatpush1.bf16.msra.mxu1 %v2997_v5  ;;  %v3096_v4 = vld [vmem:[%s3434_s13 + $0x154] ss:$24 sps:$4 sm:$0xff]   ;;  %v3090_v5 = vld [vmem:[%s4074_s1 + $0x3a0] ss:$16 sps:$4 sm:$0xff]  }
  0x48   : > { %1756 = vmatprep.subr.bf16.mxu0 %v3002_v6  ;;  %2095 = vmatprep.subr.bf16.mxu1 %v3005_v7  ;;  %v3093_v6 = vld [vmem:[%s4074_s1 + $0x3a8] ss:$16 sps:$4 sm:$0xff]   ;;  %v3101_v7 = vld [vmem:[%s4074_s1 + $0x3c4] ss:$16 sps:$4 sm:$0xff]  }
  0x49   : > { %1683 = vmatprep.mubr.bf16.mxu0 %v3006_v8  ;;  %2022 = vmatprep.mubr.bf16.mxu1 %v3006_v8  ;;  %v3104_v8 = vld [vmem:[%s4074_s1 + $0x3cc] ss:$16 sps:$4 sm:$0xff]  }
  0x4b   : > { %1757 = vmatpush1.bf16.msra.mxu0 %v3000_v9  ;;  %2096 = vmatpush1.bf16.msra.mxu1 %v3003_v10  ;;  %v3098_v9 = vld [vmem:[%s3434_s13 + $0x150] ss:$24 sps:$4 sm:$0xff]  }
  0x4c   : > { %1758 = vmatprep.subr.bf16.mxu0 %v3011_v11  ;;  %2097 = vmatprep.subr.bf16.mxu1 %v3014_v12  ;;  %v3099_v10 = vld [vmem:[%s4074_s1 + $0x3c0] ss:$16 sps:$4 sm:$0xff]   ;;  %v3102_v11 = vld [vmem:[%s4074_s1 + $0x3c8] ss:$16 sps:$4 sm:$0xff]   ;;  %v3107_v12 = vld [vmem:[%s4074_s1 + $0x3e4] ss:$16 sps:$4 sm:$0xff]  }
  0x4e   : > { %1684 = vmatmul.mubr.bf16.gmra.mrb[4].mxu0 %v3008_v13  ;;  %2023 = vmatmul.mubr.bf16.gmra.mrb[4].mxu1 %v3008_v13  ;;  %v3110_v13 = vld [vmem:[%s4074_s1 + $0x3ec] ss:$16 sps:$4 sm:$0xff]  }
  0x4f   : > { %1759 = vmatpush1.bf16.msra.mxu0 %v3009_v14  ;;  %2098 = vmatpush1.bf16.msra.mxu1 %v3012_v15  ;;  %v3113_v14 = vld [vmem:[%s3434_s13 + $0xc] ss:$24 sps:$4 sm:$0xff]   ;;  %v3105_v15 = vld [vmem:[%s4074_s1 + $0x3e0] ss:$16 sps:$4 sm:$0xff]  }
  0x50   : > { %1760 = vmatprep.subr.bf16.mxu0 %v3017_v16  ;;  %2099 = vmatprep.subr.bf16.mxu1 %v3020_v17  ;;  %v3108_v16 = vld [vmem:[%s4074_s1 + $0x3e8] ss:$16 sps:$4 sm:$0xff]   ;;  %v3116_v17 = vld [vmem:[%s4074_s1 + $0x404] ss:$16 sps:$4 sm:$0xff]  }
  0x51   : > { %1693 = vmatprep.mubr.bf16.mxu0 %v3021_v18  ;;  %2032 = vmatprep.mubr.bf16.mxu1 %v3021_v18  ;;  %v3119_v18 = vld [vmem:[%s4074_s1 + $0x40c] ss:$16 sps:$4 sm:$0xff]  }
  0x53   : > { %1761 = vmatpush1.bf16.msra.mxu0 %v3015_v19  ;;  %2100 = vmatpush1.bf16.msra.mxu1 %v3018_v20  ;;  %v3111_v19 = vld [vmem:[%s3434_s13 + $0x8] ss:$24 sps:$4 sm:$0xff]  }
  0x54   : > { %1762 = vmatprep.subr.bf16.mxu0 %v3026_v21  ;;  %2101 = vmatprep.subr.bf16.mxu1 %v3029_v22  ;;  %v3114_v20 = vld [vmem:[%s4074_s1 + $0x400] ss:$16 sps:$4 sm:$0xff]   ;;  %v3117_v21 = vld [vmem:[%s4074_s1 + $0x408] ss:$16 sps:$4 sm:$0xff]   ;;  %v3122_v22 = vld [vmem:[%s4074_s1 + $0x424] ss:$16 sps:$4 sm:$0xff]  }
  0x56   : > { %1694 = vmatmul.mubr.bf16.gmra.mrb[8].mxu0 %v3023_v23  ;;  %2033 = vmatmul.mubr.bf16.gmra.mrb[8].mxu1 %v3023_v23  ;;  %v3125_v23 = vld [vmem:[%s4074_s1 + $0x42c] ss:$16 sps:$4 sm:$0xff]  }
  0x57   : > { %1763 = vmatpush1.bf16.msra.mxu0 %v3024_v24  ;;  %2102 = vmatpush1.bf16.msra.mxu1 %v3027_v25  ;;  %v3126_v24 = vld [vmem:[%s3434_s13 + $0x3c] ss:$24 sps:$4 sm:$0xff]   ;;  %v3120_v25 = vld [vmem:[%s4074_s1 + $0x420] ss:$16 sps:$4 sm:$0xff]  }
  0x58   : > { %1764 = vmatprep.subr.bf16.mxu0 %v3032_v26  ;;  %2103 = vmatprep.subr.bf16.mxu1 %v3035_v27  ;;  %v3123_v26 = vld [vmem:[%s4074_s1 + $0x428] ss:$16 sps:$4 sm:$0xff]   ;;  %v3131_v27 = vld [vmem:[%s4074_s1 + $0x444] ss:$16 sps:$4 sm:$0xff]  }
  0x59   : > { %1703 = vmatprep.mubr.bf16.mxu0 %v3036_v28  ;;  %2042 = vmatprep.mubr.bf16.mxu1 %v3036_v28  ;;  %v3134_v28 = vld [vmem:[%s4074_s1 + $0x44c] ss:$16 sps:$4 sm:$0xff]  }
  0x5b   : > { %1765 = vmatpush1.bf16.msra.mxu0 %v3030_v29  ;;  %2104 = vmatpush1.bf16.msra.mxu1 %v3033_v30  ;;  %v3128_v29 = vld [vmem:[%s3434_s13 + $0x38] ss:$24 sps:$4 sm:$0xff]  }
  0x5c   : > { %1766 = vmatprep.subr.bf16.mxu0 %v3041_v31  ;;  %2105 = vmatprep.subr.bf16.mxu1 %v3044_v32  ;;  %v3129_v30 = vld [vmem:[%s4074_s1 + $0x440] ss:$16 sps:$4 sm:$0xff]   ;;  %v3132_v31 = vld [vmem:[%s4074_s1 + $0x448] ss:$16 sps:$4 sm:$0xff]   ;;  %v3137_v32 = vld [vmem:[%s4074_s1 + $0x464] ss:$16 sps:$4 sm:$0xff]  }
  0x5e   : > { %1704 = vmatmul.mubr.bf16.gmra.mrb[12].mxu0 %v3038_v33  ;;  %2043 = vmatmul.mubr.bf16.gmra.mrb[12].mxu1 %v3038_v33  ;;  %v3140_v33 = vld [vmem:[%s4074_s1 + $0x46c] ss:$16 sps:$4 sm:$0xff]  }
  0x5f   : > { %1767 = vmatpush1.bf16.msra.mxu0 %v3039_v34  ;;  %2106 = vmatpush1.bf16.msra.mxu1 %v3042_v35  ;;  %v3141_v34 = vld [vmem:[%s3434_s13 + $0x6c] ss:$24 sps:$4 sm:$0xff]   ;;  %v3135_v35 = vld [vmem:[%s4074_s1 + $0x460] ss:$16 sps:$4 sm:$0xff]  }
  0x60   : > { %1768 = vmatprep.subr.bf16.mxu0 %v3047_v36  ;;  %2107 = vmatprep.subr.bf16.mxu1 %v3050_v37  ;;  %v3138_v36 = vld [vmem:[%s4074_s1 + $0x468] ss:$16 sps:$4 sm:$0xff]   ;;  %v3146_v37 = vld [vmem:[%s4074_s1 + $0x484] ss:$16 sps:$4 sm:$0xff]  }
  0x61   : > { %1713 = vmatprep.mubr.bf16.mxu0 %v3051_v38  ;;  %2052 = vmatprep.mubr.bf16.mxu1 %v3051_v38  ;;  %v3149_v38 = vld [vmem:[%s4074_s1 + $0x48c] ss:$16 sps:$4 sm:$0xff]  }
  0x63   : > { %1769 = vmatpush1.bf16.msra.mxu0 %v3045_v39  ;;  %2108 = vmatpush1.bf16.msra.mxu1 %v3048_v40  ;;  %v3143_v39 = vld [vmem:[%s3434_s13 + $0x68] ss:$24 sps:$4 sm:$0xff]  }
  0x64   : > { %1770 = vmatprep.subr.bf16.mxu0 %v3056_v41  ;;  %2109 = vmatprep.subr.bf16.mxu1 %v3059_v42  ;;  %v3144_v40 = vld [vmem:[%s4074_s1 + $0x480] ss:$16 sps:$4 sm:$0xff]   ;;  %v3147_v41 = vld [vmem:[%s4074_s1 + $0x488] ss:$16 sps:$4 sm:$0xff]   ;;  %v3152_v42 = vld [vmem:[%s4074_s1 + $0x4a4] ss:$16 sps:$4 sm:$0xff]  }
  0x66   : > { %1714 = vmatmul.mubr.bf16.gmra.mrb[16].mxu0 %v3053_v43  ;;  %2053 = vmatmul.mubr.bf16.gmra.mrb[16].mxu1 %v3053_v43  ;;  %v3155_v43 = vld [vmem:[%s4074_s1 + $0x4ac] ss:$16 sps:$4 sm:$0xff]  }
  0x67   : > { %1771 = vmatpush1.bf16.msra.mxu0 %v3054_v44  ;;  %2110 = vmatpush1.bf16.msra.mxu1 %v3057_v45  ;;  %v3156_v44 = vld [vmem:[%s3434_s13 + $0x9c] ss:$24 sps:$4 sm:$0xff]   ;;  %v3150_v45 = vld [vmem:[%s4074_s1 + $0x4a0] ss:$16 sps:$4 sm:$0xff]  }
  0x68   : > { %1772 = vmatprep.subr.bf16.mxu0 %v3062_v46  ;;  %2111 = vmatprep.subr.bf16.mxu1 %v3065_v47  ;;  %v3153_v46 = vld [vmem:[%s4074_s1 + $0x4a8] ss:$16 sps:$4 sm:$0xff]   ;;  %v3161_v47 = vld [vmem:[%s4074_s1 + $0x4c4] ss:$16 sps:$4 sm:$0xff]  }
  0x69   : > { %1723 = vmatprep.mubr.bf16.mxu0 %v3066_v48  ;;  %2062 = vmatprep.mubr.bf16.mxu1 %v3066_v48  ;;  %v3164_v48 = vld [vmem:[%s4074_s1 + $0x4cc] ss:$16 sps:$4 sm:$0xff]  }
  0x6b   : > { %1773 = vmatpush1.bf16.msra.mxu0 %v3060_v49  ;;  %2112 = vmatpush1.bf16.msra.mxu1 %v3063_v50  ;;  %v3158_v49 = vld [vmem:[%s3434_s13 + $0x98] ss:$24 sps:$4 sm:$0xff]  }
  0x6c   : > { %1774 = vmatprep.subr.bf16.mxu0 %v3071_v51  ;;  %2113 = vmatprep.subr.bf16.mxu1 %v3074_v52  ;;  %v3159_v50 = vld [vmem:[%s4074_s1 + $0x4c0] ss:$16 sps:$4 sm:$0xff]   ;;  %v3162_v51 = vld [vmem:[%s4074_s1 + $0x4c8] ss:$16 sps:$4 sm:$0xff]   ;;  %v3167_v52 = vld [vmem:[%s4074_s1 + $0x4e4] ss:$16 sps:$4 sm:$0xff]  }
  0x6e   : > { %1724 = vmatmul.mubr.bf16.gmra.mrb[20].mxu0 %v3068_v53  ;;  %2063 = vmatmul.mubr.bf16.gmra.mrb[20].mxu1 %v3068_v53  ;;  %v3170_v53 = vld [vmem:[%s4074_s1 + $0x4ec] ss:$16 sps:$4 sm:$0xff]  }
  0x6f   : > { %1775 = vmatpush1.bf16.msra.mxu0 %v3069_v54  ;;  %2114 = vmatpush1.bf16.msra.mxu1 %v3072_v55  ;;  %v3171_v54 = vld [vmem:[%s3434_s13 + $0xcc] ss:$24 sps:$4 sm:$0xff]   ;;  %v3165_v55 = vld [vmem:[%s4074_s1 + $0x4e0] ss:$16 sps:$4 sm:$0xff]  }
  0x70   : > { %1776 = vmatprep.subr.bf16.mxu0 %v3077_v56  ;;  %2115 = vmatprep.subr.bf16.mxu1 %v3080_v57  ;;  %v3168_v56 = vld [vmem:[%s4074_s1 + $0x4e8] ss:$16 sps:$4 sm:$0xff]   ;;  %v3176_v57 = vld [vmem:[%s4074_s1 + $0x504] ss:$16 sps:$4 sm:$0xff]  }
  0x71   : > { %1733 = vmatprep.mubr.bf16.mxu0 %v3081_v58  ;;  %2072 = vmatprep.mubr.bf16.mxu1 %v3081_v58  ;;  %v3179_v58 = vld [vmem:[%s4074_s1 + $0x50c] ss:$16 sps:$4 sm:$0xff]  }
  0x73   : > { %1777 = vmatpush1.bf16.msra.mxu0 %v3075_v59  ;;  %2116 = vmatpush1.bf16.msra.mxu1 %v3078_v60  ;;  %v3173_v59 = vld [vmem:[%s3434_s13 + $0xc8] ss:$24 sps:$4 sm:$0xff]  }
  0x74   : > { %1778 = vmatprep.subr.bf16.mxu0 %v3086_v61  ;;  %2117 = vmatprep.subr.bf16.mxu1 %v3089_v62  ;;  %v3174_v60 = vld [vmem:[%s4074_s1 + $0x500] ss:$16 sps:$4 sm:$0xff]   ;;  %v3177_v61 = vld [vmem:[%s4074_s1 + $0x508] ss:$16 sps:$4 sm:$0xff]   ;;  %v3182_v62 = vld [vmem:[%s4074_s1 + $0x524] ss:$16 sps:$4 sm:$0xff]  }
  0x76   : > { %1734 = vmatmul.mubr.bf16.gmra.mrb[24].mxu0 %v3083_v63  ;;  %2073 = vmatmul.mubr.bf16.gmra.mrb[24].mxu1 %v3083_v63  ;;  %v3185_v63 = vld [vmem:[%s4074_s1 + $0x52c] ss:$16 sps:$4 sm:$0xff]  }
  0x77   : > { %1779 = vmatpush1.bf16.msra.mxu0 %v3084_v0  ;;  %2118 = vmatpush1.bf16.msra.mxu1 %v3087_v1  ;;  %v3186_v0 = vld [vmem:[%s3434_s13 + $0xfc] ss:$24 sps:$4 sm:$0xff]   ;;  %v3180_v1 = vld [vmem:[%s4074_s1 + $0x520] ss:$16 sps:$4 sm:$0xff]  }
  0x78   : > { %1780 = vmatprep.subr.bf16.mxu0 %v3092_v2  ;;  %2119 = vmatprep.subr.bf16.mxu1 %v3095_v3  ;;  %v3183_v2 = vld [vmem:[%s4074_s1 + $0x528] ss:$16 sps:$4 sm:$0xff]   ;;  %v3191_v3 = vld [vmem:[%s4074_s1 + $0x544] ss:$16 sps:$4 sm:$0xff]  }
  0x79   : > { %1743 = vmatprep.mubr.bf16.mxu0 %v3096_v4  ;;  %2082 = vmatprep.mubr.bf16.mxu1 %v3096_v4  ;;  %v3194_v4 = vld [vmem:[%s4074_s1 + $0x54c] ss:$16 sps:$4 sm:$0xff]  }
  0x7b   : > { %1781 = vmatpush1.bf16.msra.mxu0 %v3090_v5  ;;  %2120 = vmatpush1.bf16.msra.mxu1 %v3093_v6  ;;  %v3188_v5 = vld [vmem:[%s3434_s13 + $0xf8] ss:$24 sps:$4 sm:$0xff]  }
  0x7c   : > { %1782 = vmatprep.subr.bf16.mxu0 %v3101_v7  ;;  %2121 = vmatprep.subr.bf16.mxu1 %v3104_v8  ;;  %v3189_v6 = vld [vmem:[%s4074_s1 + $0x540] ss:$16 sps:$4 sm:$0xff]   ;;  %v3192_v7 = vld [vmem:[%s4074_s1 + $0x548] ss:$16 sps:$4 sm:$0xff]   ;;  %v3197_v8 = vld [vmem:[%s4074_s1 + $0x564] ss:$16 sps:$4 sm:$0xff]  }
  0x7e   : > { %1744 = vmatmul.mubr.bf16.gmra.mrb[28].mxu0 %v3098_v9  ;;  %2083 = vmatmul.mubr.bf16.gmra.mrb[28].mxu1 %v3098_v9  ;;  %v3200_v9 = vld [vmem:[%s4074_s1 + $0x56c] ss:$16 sps:$4 sm:$0xff]  }
  0x7f   : > { %1783 = vmatpush1.bf16.msra.mxu0 %v3099_v10  ;;  %2122 = vmatpush1.bf16.msra.mxu1 %v3102_v11  ;;  %v3201_v10 = vld [vmem:[%s3434_s13 + $0x12c] ss:$24 sps:$4 sm:$0xff]   ;;  %v3195_v11 = vld [vmem:[%s4074_s1 + $0x560] ss:$16 sps:$4 sm:$0xff]  }
  0x80   : > { %1784 = vmatprep.subr.bf16.mxu0 %v3107_v12  ;;  %2123 = vmatprep.subr.bf16.mxu1 %v3110_v13  ;;  %v3198_v12 = vld [vmem:[%s4074_s1 + $0x568] ss:$16 sps:$4 sm:$0xff]   ;;  %v3206_v13 = vld [vmem:[%s4074_s1 + $0x584] ss:$16 sps:$4 sm:$0xff]  }
  0x81   : > { %1786 = vmatprep.mubr.bf16.mxu0 %v3113_v14  ;;  %2125 = vmatprep.mubr.bf16.mxu1 %v3113_v14  ;;  %v3209_v14 = vld [vmem:[%s4074_s1 + $0x58c] ss:$16 sps:$4 sm:$0xff]  }
  0x83   : > { %1785 = vmatpush1.bf16.msra.mxu0 %v3105_v15  ;;  %2124 = vmatpush1.bf16.msra.mxu1 %v3108_v16  ;;  %v3203_v15 = vld [vmem:[%s3434_s13 + $0x128] ss:$24 sps:$4 sm:$0xff]  }
  0x84   : > { %1867 = vmatprep.subr.bf16.mxu0 %v3116_v17  ;;  %2206 = vmatprep.subr.bf16.mxu1 %v3119_v18  ;;  %v3204_v16 = vld [vmem:[%s4074_s1 + $0x580] ss:$16 sps:$4 sm:$0xff]   ;;  %v3207_v17 = vld [vmem:[%s4074_s1 + $0x588] ss:$16 sps:$4 sm:$0xff]   ;;  %v3212_v18 = vld [vmem:[%s4074_s1 + $0x5a4] ss:$16 sps:$4 sm:$0xff]  }
  0x86   : > { %1787 = vmatmul.mubr.bf16.vlgmr.msra.gmra.mrb[0].mxu0 %v3111_v19  ;;  %2126 = vmatmul.mubr.bf16.vlgmr.msra.gmra.mrb[0].mxu1 %v3111_v19  ;;  %v3215_v19 = vld [vmem:[%s4074_s1 + $0x5ac] ss:$16 sps:$4 sm:$0xff]  }
  0x87   : > { %1868 = vmatpush1.bf16.msra.mxu0 %v3114_v20  ;;  %2207 = vmatpush1.bf16.msra.mxu1 %v3117_v21  ;;  %v3216_v20 = vld [vmem:[%s3434_s13 + $0x15c] ss:$24 sps:$4 sm:$0xff]   ;;  %v3210_v21 = vld [vmem:[%s4074_s1 + $0x5a0] ss:$16 sps:$4 sm:$0xff]  }
  0x88   : > { %1869 = vmatprep.subr.bf16.mxu0 %v3122_v22  ;;  %2208 = vmatprep.subr.bf16.mxu1 %v3125_v23  ;;  %v3213_v22 = vld [vmem:[%s4074_s1 + $0x5a8] ss:$16 sps:$4 sm:$0xff]   ;;  %v3221_v23 = vld [vmem:[%s4074_s1 + $0x5c4] ss:$16 sps:$4 sm:$0xff]  }
  0x89   : > { %1796 = vmatprep.mubr.bf16.mxu0 %v3126_v24  ;;  %2135 = vmatprep.mubr.bf16.mxu1 %v3126_v24  ;;  %v3224_v24 = vld [vmem:[%s4074_s1 + $0x5cc] ss:$16 sps:$4 sm:$0xff]  }
  0x8b   : > { %1870 = vmatpush1.bf16.msra.mxu0 %v3120_v25  ;;  %2209 = vmatpush1.bf16.msra.mxu1 %v3123_v26  ;;  %v3218_v25 = vld [vmem:[%s3434_s13 + $0x158] ss:$24 sps:$4 sm:$0xff]  }
  0x8c   : > { %1871 = vmatprep.subr.bf16.mxu0 %v3131_v27  ;;  %2210 = vmatprep.subr.bf16.mxu1 %v3134_v28  ;;  %v3219_v26 = vld [vmem:[%s4074_s1 + $0x5c0] ss:$16 sps:$4 sm:$0xff]   ;;  %v3222_v27 = vld [vmem:[%s4074_s1 + $0x5c8] ss:$16 sps:$4 sm:$0xff]   ;;  %v3227_v28 = vld [vmem:[%s4074_s1 + $0x5e4] ss:$16 sps:$4 sm:$0xff]  }
  0x8e   : > { %1797 = vmatmul.mubr.bf16.gmra.mrb[4].mxu0 %v3128_v29  ;;  %2136 = vmatmul.mubr.bf16.gmra.mrb[4].mxu1 %v3128_v29  ;;  %v3230_v29 = vld [vmem:[%s4074_s1 + $0x5ec] ss:$16 sps:$4 sm:$0xff]  }
  0x8f   : > { %1872 = vmatpush1.bf16.msra.mxu0 %v3129_v30  ;;  %2211 = vmatpush1.bf16.msra.mxu1 %v3132_v31  ;;  %v3233_v30 = vld [vmem:[%s3434_s13 + $0x14] ss:$24 sps:$4 sm:$0xff]   ;;  %v3225_v31 = vld [vmem:[%s4074_s1 + $0x5e0] ss:$16 sps:$4 sm:$0xff]  }
  0x90   : > { %1873 = vmatprep.subr.bf16.mxu0 %v3137_v32  ;;  %2212 = vmatprep.subr.bf16.mxu1 %v3140_v33  ;;  %v3228_v32 = vld [vmem:[%s4074_s1 + $0x5e8] ss:$16 sps:$4 sm:$0xff]  }
  0x91   : > { %1806 = vmatprep.mubr.bf16.mxu0 %v3141_v34  ;;  %2145 = vmatprep.mubr.bf16.mxu1 %v3141_v34  ;;  %v3231_v33 = vld [vmem:[%s3434_s13 + $0x10] ss:$24 sps:$4 sm:$0xff]   ;;  %v3234_v34 = vld [vmem:[%s3434_s13 + $0x44] ss:$24 sps:$4 sm:$0xff]  }
  0x93   : > { %1874 = vmatpush1.bf16.msra.mxu0 %v3135_v35  ;;  %2213 = vmatpush1.bf16.msra.mxu1 %v3138_v36  ;;  %v3236_v35 = vld [vmem:[%s3434_s13 + $0x40] ss:$24 sps:$4 sm:$0xff]   ;;  %v3237_v36 = vld [vmem:[%s3434_s13 + $0x74] ss:$24 sps:$4 sm:$0xff]  }
  0x94   : > { %1875 = vmatprep.subr.bf16.mxu0 %v3146_v37  ;;  %2214 = vmatprep.subr.bf16.mxu1 %v3149_v38  ;;  %v3239_v37 = vld [vmem:[%s3434_s13 + $0x70] ss:$24 sps:$4 sm:$0xff]   ;;  %v3240_v38 = vld [vmem:[%s3434_s13 + $0xa4] ss:$24 sps:$4 sm:$0xff]  }
  0x96   : > { %1807 = vmatmul.mubr.bf16.gmra.mrb[8].mxu0 %v3143_v39  ;;  %2146 = vmatmul.mubr.bf16.gmra.mrb[8].mxu1 %v3143_v39  ;;  %v3242_v39 = vld [vmem:[%s3434_s13 + $0xa0] ss:$24 sps:$4 sm:$0xff]  }
  0x97   : > { %1876 = vmatpush1.bf16.msra.mxu0 %v3144_v40  ;;  %2215 = vmatpush1.bf16.msra.mxu1 %v3147_v41  ;;  %v3243_v40 = vld [vmem:[%s3434_s13 + $0xd4] ss:$24 sps:$4 sm:$0xff]   ;;  %v3245_v41 = vld [vmem:[%s3434_s13 + $0xd0] ss:$24 sps:$4 sm:$0xff]  }
  0x98   : > { %1877 = vmatprep.subr.bf16.mxu0 %v3152_v42  ;;  %2216 = vmatprep.subr.bf16.mxu1 %v3155_v43  ;;  %v3246_v42 = vld [vmem:[%s3434_s13 + $0x104] ss:$24 sps:$4 sm:$0xff]   ;;  %v3248_v43 = vld [vmem:[%s3434_s13 + $0x100] ss:$24 sps:$4 sm:$0xff]  }
  0x99   : > { %1816 = vmatprep.mubr.bf16.mxu0 %v3156_v44  ;;  %2155 = vmatprep.mubr.bf16.mxu1 %v3156_v44  ;;  %v3249_v44 = vld [vmem:[%s3434_s13 + $0x134] ss:$24 sps:$4 sm:$0xff]  }
  0x9b   : > { %1878 = vmatpush1.bf16.msra.mxu0 %v3150_v45  ;;  %2217 = vmatpush1.bf16.msra.mxu1 %v3153_v46  ;;  %v3251_v45 = vld [vmem:[%s3434_s13 + $0x130] ss:$24 sps:$4 sm:$0xff]   ;;  %v3252_v46 = vld [vmem:[%s3434_s13 + $0x164] ss:$24 sps:$4 sm:$0xff]  }
  0x9c   : > { %1879 = vmatprep.subr.bf16.mxu0 %v3161_v47  ;;  %2218 = vmatprep.subr.bf16.mxu1 %v3164_v48  ;;  %v3254_v47 = vld [vmem:[%s3434_s13 + $0x160] ss:$24 sps:$4 sm:$0xff]   ;;  %v421_v48 = vlaneseq }
  0x9e   : > { %1817 = vmatmul.mubr.bf16.gmra.mrb[12].mxu0 %v3158_v49  ;;  %2156 = vmatmul.mubr.bf16.gmra.mrb[12].mxu1 %v3158_v49  ;;  %v422_v49 = vshrl.u32 %v421_v48, 7 }
  0x9f   : > { %1880 = vmatpush1.bf16.msra.mxu0 %v3159_v50  ;;  %2219 = vmatpush1.bf16.msra.mxu1 %v3162_v51 }
  0xa0   : > { %1881 = vmatprep.subr.bf16.mxu0 %v3167_v52  ;;  %2220 = vmatprep.subr.bf16.mxu1 %v3170_v53  ;;  %v423_v50 = vsub.s32 0, %v422_v49  ;;  %v431_v51 = vsub.s32 2, %v422_v49  ;;  %v419_v52 = vld [vmem:[%s4075_s2] sm:$0xf]  ;;  %v427_v53 = vsub.s32 1, %v422_v49 }
  0xa1   : > { %1826 = vmatprep.mubr.bf16.mxu0 %v3171_v54  ;;  %2165 = vmatprep.mubr.bf16.mxu1 %v3171_v54  ;;  %v435_v54 = vsub.s32 3, %v422_v49 }
  0xa3   : > { %1882 = vmatpush1.bf16.msra.mxu0 %v3165_v55  ;;  %2221 = vmatpush1.bf16.msra.mxu1 %v3168_v56  ;;  %v3929_v55 = vrot.slane %v419_v52, %v423_v50  ;;  %v3931_v56 = vrot.slane %v419_v52, %v431_v51 }
  0xa4   : > { %1883 = vmatprep.subr.bf16.mxu0 %v3176_v57  ;;  %2222 = vmatprep.subr.bf16.mxu1 %v3179_v58  ;;  %v3933_v57 = vrot.slane %v419_v52, %v427_v53  ;;  %v3935_v58 = vrot.slane %v419_v52, %v435_v54 }
  0xa6   : > { %1827 = vmatmul.mubr.bf16.gmra.mrb[16].mxu0 %v3173_v59  ;;  %2166 = vmatmul.mubr.bf16.gmra.mrb[16].mxu1 %v3173_v59 }
  0xa7   : > { %1884 = vmatpush1.bf16.msra.mxu0 %v3174_v60  ;;  %2223 = vmatpush1.bf16.msra.mxu1 %v3177_v61 }
  0xa8   : > { %1885 = vmatprep.subr.bf16.mxu0 %v3182_v62  ;;  %2224 = vmatprep.subr.bf16.mxu1 %v3185_v63 }
  0xa9   : > { %1836 = vmatprep.mubr.bf16.mxu0 %v3186_v0  ;;  %2175 = vmatprep.mubr.bf16.mxu1 %v3186_v0 }
  0xab   : > { %1886 = vmatpush1.bf16.msra.mxu0 %v3180_v1  ;;  %2225 = vmatpush1.bf16.msra.mxu1 %v3183_v2 }
  0xac   : > { %1887 = vmatprep.subr.bf16.mxu0 %v3191_v3  ;;  %2226 = vmatprep.subr.bf16.mxu1 %v3194_v4 }
  0xae   : > { %1837 = vmatmul.mubr.bf16.gmra.mrb[20].mxu0 %v3188_v5  ;;  %2176 = vmatmul.mubr.bf16.gmra.mrb[20].mxu1 %v3188_v5 }
  0xaf   : > { %1888 = vmatpush1.bf16.msra.mxu0 %v3189_v6  ;;  %2227 = vmatpush1.bf16.msra.mxu1 %v3192_v7 }
  0xb0   : > { %1889 = vmatprep.subr.bf16.mxu0 %v3197_v8  ;;  %2228 = vmatprep.subr.bf16.mxu1 %v3200_v9 }
  0xb1   : > { %1846 = vmatprep.mubr.bf16.mxu0 %v3201_v10  ;;  %2185 = vmatprep.mubr.bf16.mxu1 %v3201_v10 }
  0xb3   : > { %1890 = vmatpush1.bf16.msra.mxu0 %v3195_v11  ;;  %2229 = vmatpush1.bf16.msra.mxu1 %v3198_v12 }
  0xb4   : > { %1891 = vmatprep.subr.bf16.mxu0 %v3206_v13  ;;  %2230 = vmatprep.subr.bf16.mxu1 %v3209_v14 }
  0xb6   : > { %1847 = vmatmul.mubr.bf16.gmra.mrb[24].mxu0 %v3203_v15  ;;  %2186 = vmatmul.mubr.bf16.gmra.mrb[24].mxu1 %v3203_v15 }
  0xb7   : > { %1892 = vmatpush1.bf16.msra.mxu0 %v3204_v16  ;;  %2231 = vmatpush1.bf16.msra.mxu1 %v3207_v17 }
  0xb8   : > { %1893 = vmatprep.subr.bf16.mxu0 %v3212_v18  ;;  %2232 = vmatprep.subr.bf16.mxu1 %v3215_v19 }
  0xb9   : > { %1856 = vmatprep.mubr.bf16.mxu0 %v3216_v20  ;;  %2195 = vmatprep.mubr.bf16.mxu1 %v3216_v20 }
  0xbb   : > { %1894 = vmatpush1.bf16.msra.mxu0 %v3210_v21  ;;  %2233 = vmatpush1.bf16.msra.mxu1 %v3213_v22 }
  0xbc   : > { %1895 = vmatprep.subr.bf16.mxu0 %v3221_v23  ;;  %2234 = vmatprep.subr.bf16.mxu1 %v3224_v24 }
  0xbe   : > { %1857 = vmatmul.mubr.bf16.gmra.mrb[28].mxu0 %v3218_v25  ;;  %2196 = vmatmul.mubr.bf16.gmra.mrb[28].mxu1 %v3218_v25 }
  0xbf   : > { %1896 = vmatpush1.bf16.msra.mxu0 %v3219_v26  ;;  %2235 = vmatpush1.bf16.msra.mxu1 %v3222_v27 }
  0xc0   : > { %1897 = vmatprep.subr.bf16.mxu0 %v3227_v28  ;;  %2236 = vmatprep.subr.bf16.mxu1 %v3230_v29 }
  0xc1   : > { %1899 = vmatprep.mubr.bf16.mxu0 %v3233_v30  ;;  %2238 = vmatprep.mubr.bf16.mxu1 %v3233_v30 }
  0xc3   : > { %1898 = vmatpush1.bf16.msra.mxu0 %v3225_v31  ;;  %2237 = vmatpush1.bf16.msra.mxu1 %v3228_v32 }
  0xc6   : > { %1900 = vmatmul.mubr.bf16.vlgmr.msra.gmra.mrb[0].mxu0 %v3231_v33  ;;  %2239 = vmatmul.mubr.bf16.vlgmr.msra.gmra.mrb[0].mxu1 %v3231_v33 }
  0xc7   : > { %1909 = vmatprep.mubr.bf16.mxu0 %v3234_v34  ;;  %2248 = vmatprep.mubr.bf16.mxu1 %v3234_v34 }
  0xce   : > { %1910 = vmatmul.mubr.bf16.gmra.mrb[4].mxu0 %v3236_v35  ;;  %2249 = vmatmul.mubr.bf16.gmra.mrb[4].mxu1 %v3236_v35 }
  0xcf   : > { %1919 = vmatprep.mubr.bf16.mxu0 %v3237_v36  ;;  %2258 = vmatprep.mubr.bf16.mxu1 %v3237_v36 }
  0xd6   : > { %1920 = vmatmul.mubr.bf16.gmra.mrb[8].mxu0 %v3239_v37  ;;  %2259 = vmatmul.mubr.bf16.gmra.mrb[8].mxu1 %v3239_v37 }
  0xd7   : > { %1929 = vmatprep.mubr.bf16.mxu0 %v3240_v38  ;;  %2268 = vmatprep.mubr.bf16.mxu1 %v3240_v38 }
  0xde   : > { %1930 = vmatmul.mubr.bf16.gmra.mrb[12].mxu0 %v3242_v39  ;;  %2269 = vmatmul.mubr.bf16.gmra.mrb[12].mxu1 %v3242_v39 }
  0xdf   : > { %1939 = vmatprep.mubr.bf16.mxu0 %v3243_v40  ;;  %2278 = vmatprep.mubr.bf16.mxu1 %v3243_v40 }
  0xe6   : > { %1940 = vmatmul.mubr.bf16.gmra.mrb[16].mxu0 %v3245_v41  ;;  %2279 = vmatmul.mubr.bf16.gmra.mrb[16].mxu1 %v3245_v41 }
  0xe7   : > { %1949 = vmatprep.mubr.bf16.mxu0 %v3246_v42  ;;  %2288 = vmatprep.mubr.bf16.mxu1 %v3246_v42 }
  0xee   : > { %1950 = vmatmul.mubr.bf16.gmra.mrb[20].mxu0 %v3248_v43  ;;  %2289 = vmatmul.mubr.bf16.gmra.mrb[20].mxu1 %v3248_v43 }
  0xef   : > { %1959 = vmatprep.mubr.bf16.mxu0 %v3249_v44  ;;  %2298 = vmatprep.mubr.bf16.mxu1 %v3249_v44 }
  0xf6   : > { %1960 = vmatmul.mubr.bf16.gmra.mrb[24].mxu0 %v3251_v45  ;;  %2299 = vmatmul.mubr.bf16.gmra.mrb[24].mxu1 %v3251_v45 }
  0xf7   : > { %1969 = vmatprep.mubr.bf16.mxu0 %v3252_v46  ;;  %2308 = vmatprep.mubr.bf16.mxu1 %v3252_v46 }
  0xfe   : > { %1970 = vmatmul.mubr.bf16.gmra.mrb[28].mxu0 %v3254_v47  ;;  %2309 = vmatmul.mubr.bf16.gmra.mrb[28].mxu1 %v3254_v47 }
 0x199   : > { %v1901_v59 = vpop.f32.mrb[0].mxu0  ;;  %v2240_v60 = vpop.f32.mrb[0].mxu1 }
 0x19a   : > { %v2694_v61 = vadd.f32 %v1901_v59, %v3929_v55  ;;  %v2726_v62 = vadd.f32 %v2240_v60, %v3931_v56  ;;  %v1903_v63 = vpop.f32.mrb[1].mxu0  ;;  %v2242_v0 = vpop.f32.mrb[1].mxu1 }
 0x19b   : > { %v2695_v1 = vadd.f32 %v1903_v63, %v3933_v57  ;;  %v2727_v2 = vadd.f32 %v2242_v0, %v3935_v58  ;;  %v1905_v3 = vpop.f32.mrb[2].mxu0  ;;  %v2244_v4 = vpop.f32.mrb[2].mxu1 }
 0x19c   : > { %2319 = vst [vmem:[%s3940_s18] sm:$0xff] %v2694_v61  ;;  %2321 = vst [vmem:[%s3940_s18 + $0x10] sm:$0xff] %v2726_v62  ;;  %v2696_v5 = vadd.f32 %v1905_v3, %v3929_v55  ;;  %v2728_v6 = vadd.f32 %v2244_v4, %v3931_v56  ;;  %v1907_v7 = vpop.f32.mrb[3].mxu0  ;;  %v2246_v8 = vpop.f32.mrb[3].mxu1 }
 0x19d   : > { %2320 = vst [vmem:[%s3940_s18 + $0x8] sm:$0xff] %v2695_v1  ;;  %2322 = vst [vmem:[%s3940_s18 + $0x18] sm:$0xff] %v2727_v2  ;;  %v2697_v9 = vadd.f32 %v1907_v7, %v3933_v57  ;;  %v2729_v10 = vadd.f32 %v2246_v8, %v3935_v58 }
 0x19e   : > { %2323 = vst [vmem:[%s3940_s18 + $0x20] sm:$0xff] %v2696_v5  ;;  %2325 = vst [vmem:[%s3940_s18 + $0x30] sm:$0xff] %v2728_v6 }
 0x19f   : > { %2324 = vst [vmem:[%s3940_s18 + $0x28] sm:$0xff] %v2697_v9  ;;  %2326 = vst [vmem:[%s3940_s18 + $0x38] sm:$0xff] %v2729_v10 }
 0x1a1   : > { %v1911_v11 = vpop.f32.mrb[4].mxu0  ;;  %v2250_v12 = vpop.f32.mrb[4].mxu1 }
 0x1a2   : > { %v2698_v13 = vadd.f32 %v1911_v11, %v3929_v55  ;;  %v2730_v14 = vadd.f32 %v2250_v12, %v3931_v56  ;;  %v1913_v15 = vpop.f32.mrb[5].mxu0  ;;  %v2252_v16 = vpop.f32.mrb[5].mxu1 }
 0x1a3   : > { %v2699_v17 = vadd.f32 %v1913_v15, %v3933_v57  ;;  %v2731_v18 = vadd.f32 %v2252_v16, %v3935_v58  ;;  %v1915_v19 = vpop.f32.mrb[6].mxu0  ;;  %v2254_v20 = vpop.f32.mrb[6].mxu1 }
 0x1a4   : > { %2327 = vst [vmem:[%s3940_s18 + $0x40] sm:$0xff] %v2698_v13  ;;  %2329 = vst [vmem:[%s3940_s18 + $0x50] sm:$0xff] %v2730_v14  ;;  %v2700_v21 = vadd.f32 %v1915_v19, %v3929_v55  ;;  %v2732_v22 = vadd.f32 %v2254_v20, %v3931_v56  ;;  %v1917_v23 = vpop.f32.mrb[7].mxu0  ;;  %v2256_v24 = vpop.f32.mrb[7].mxu1 }
 0x1a5   : > { %2328 = vst [vmem:[%s3940_s18 + $0x48] sm:$0xff] %v2699_v17  ;;  %2330 = vst [vmem:[%s3940_s18 + $0x58] sm:$0xff] %v2731_v18  ;;  %v2701_v25 = vadd.f32 %v1917_v23, %v3933_v57  ;;  %v2733_v26 = vadd.f32 %v2256_v24, %v3935_v58 }
 0x1a6   : > { %2331 = vst [vmem:[%s3940_s18 + $0x60] sm:$0xff] %v2700_v21  ;;  %2333 = vst [vmem:[%s3940_s18 + $0x70] sm:$0xff] %v2732_v22 }
 0x1a7   : > { %2332 = vst [vmem:[%s3940_s18 + $0x68] sm:$0xff] %v2701_v25  ;;  %2334 = vst [vmem:[%s3940_s18 + $0x78] sm:$0xff] %v2733_v26 }
 0x1a9   : > { %v1921_v27 = vpop.f32.mrb[8].mxu0  ;;  %v2260_v28 = vpop.f32.mrb[8].mxu1 }
 0x1aa   : > { %v2702_v29 = vadd.f32 %v1921_v27, %v3929_v55  ;;  %v2734_v30 = vadd.f32 %v2260_v28, %v3931_v56  ;;  %v1923_v31 = vpop.f32.mrb[9].mxu0  ;;  %v2262_v32 = vpop.f32.mrb[9].mxu1 }
 0x1ab   : > { %v2703_v33 = vadd.f32 %v1923_v31, %v3933_v57  ;;  %v2735_v34 = vadd.f32 %v2262_v32, %v3935_v58  ;;  %v1925_v35 = vpop.f32.mrb[10].mxu0  ;;  %v2264_v36 = vpop.f32.mrb[10].mxu1 }
 0x1ac   : > { %2335 = vst [vmem:[%s3940_s18 + $0x80] sm:$0xff] %v2702_v29  ;;  %2337 = vst [vmem:[%s3940_s18 + $0x90] sm:$0xff] %v2734_v30  ;;  %v2704_v37 = vadd.f32 %v1925_v35, %v3929_v55  ;;  %v2736_v38 = vadd.f32 %v2264_v36, %v3931_v56  ;;  %v1927_v39 = vpop.f32.mrb[11].mxu0  ;;  %v2266_v40 = vpop.f32.mrb[11].mxu1 }
 0x1ad   : > { %2336 = vst [vmem:[%s3940_s18 + $0x88] sm:$0xff] %v2703_v33  ;;  %2338 = vst [vmem:[%s3940_s18 + $0x98] sm:$0xff] %v2735_v34  ;;  %v2705_v41 = vadd.f32 %v1927_v39, %v3933_v57  ;;  %v2737_v42 = vadd.f32 %v2266_v40, %v3935_v58 }
 0x1ae   : > { %2339 = vst [vmem:[%s3940_s18 + $0xa0] sm:$0xff] %v2704_v37  ;;  %2341 = vst [vmem:[%s3940_s18 + $0xb0] sm:$0xff] %v2736_v38 }
 0x1af   : > { %2340 = vst [vmem:[%s3940_s18 + $0xa8] sm:$0xff] %v2705_v41  ;;  %2342 = vst [vmem:[%s3940_s18 + $0xb8] sm:$0xff] %v2737_v42 }
 0x1b1   : > { %v1931_v43 = vpop.f32.mrb[12].mxu0  ;;  %v2270_v44 = vpop.f32.mrb[12].mxu1 }
 0x1b2   : > { %v2706_v45 = vadd.f32 %v1931_v43, %v3929_v55  ;;  %v2738_v46 = vadd.f32 %v2270_v44, %v3931_v56  ;;  %v1933_v47 = vpop.f32.mrb[13].mxu0  ;;  %v2272_v48 = vpop.f32.mrb[13].mxu1 }
 0x1b3   : > { %v2707_v49 = vadd.f32 %v1933_v47, %v3933_v57  ;;  %v2739_v50 = vadd.f32 %v2272_v48, %v3935_v58  ;;  %v1935_v51 = vpop.f32.mrb[14].mxu0  ;;  %v2274_v52 = vpop.f32.mrb[14].mxu1 }
 0x1b4   : > { %2343 = vst [vmem:[%s3940_s18 + $0xc0] sm:$0xff] %v2706_v45  ;;  %2345 = vst [vmem:[%s3940_s18 + $0xd0] sm:$0xff] %v2738_v46  ;;  %v2708_v53 = vadd.f32 %v1935_v51, %v3929_v55  ;;  %v2740_v54 = vadd.f32 %v2274_v52, %v3931_v56  ;;  %v1937_v59 = vpop.f32.mrb[15].mxu0  ;;  %v2276_v60 = vpop.f32.mrb[15].mxu1 }
 0x1b5   : > { %2344 = vst [vmem:[%s3940_s18 + $0xc8] sm:$0xff] %v2707_v49  ;;  %2346 = vst [vmem:[%s3940_s18 + $0xd8] sm:$0xff] %v2739_v50  ;;  %v2709_v61 = vadd.f32 %v1937_v59, %v3933_v57  ;;  %v2741_v62 = vadd.f32 %v2276_v60, %v3935_v58 }
 0x1b6   : > { %2347 = vst [vmem:[%s3940_s18 + $0xe0] sm:$0xff] %v2708_v53  ;;  %2349 = vst [vmem:[%s3940_s18 + $0xf0] sm:$0xff] %v2740_v54 }
 0x1b7   : > { %2348 = vst [vmem:[%s3940_s18 + $0xe8] sm:$0xff] %v2709_v61  ;;  %2350 = vst [vmem:[%s3940_s18 + $0xf8] sm:$0xff] %v2741_v62 }
 0x1b9   : > { %v1941_v63 = vpop.f32.mrb[16].mxu0  ;;  %v2280_v0 = vpop.f32.mrb[16].mxu1 }
 0x1ba   : > { %v2710_v1 = vadd.f32 %v1941_v63, %v3929_v55  ;;  %v2742_v2 = vadd.f32 %v2280_v0, %v3931_v56  ;;  %v1943_v3 = vpop.f32.mrb[17].mxu0  ;;  %v2282_v4 = vpop.f32.mrb[17].mxu1 }
 0x1bb   : > { %v2711_v5 = vadd.f32 %v1943_v3, %v3933_v57  ;;  %v2743_v6 = vadd.f32 %v2282_v4, %v3935_v58  ;;  %v1945_v7 = vpop.f32.mrb[18].mxu0  ;;  %v2284_v8 = vpop.f32.mrb[18].mxu1 }
 0x1bc   : > { %2351 = vst [vmem:[%s3940_s18 + $0x100] sm:$0xff] %v2710_v1  ;;  %2353 = vst [vmem:[%s3940_s18 + $0x110] sm:$0xff] %v2742_v2  ;;  %v2712_v9 = vadd.f32 %v1945_v7, %v3929_v55  ;;  %v2744_v10 = vadd.f32 %v2284_v8, %v3931_v56  ;;  %v1947_v11 = vpop.f32.mrb[19].mxu0  ;;  %v2286_v12 = vpop.f32.mrb[19].mxu1 }
 0x1bd   : > { %2352 = vst [vmem:[%s3940_s18 + $0x108] sm:$0xff] %v2711_v5  ;;  %2354 = vst [vmem:[%s3940_s18 + $0x118] sm:$0xff] %v2743_v6  ;;  %v2713_v13 = vadd.f32 %v1947_v11, %v3933_v57  ;;  %v2745_v14 = vadd.f32 %v2286_v12, %v3935_v58 }
 0x1be   : > { %2355 = vst [vmem:[%s3940_s18 + $0x120] sm:$0xff] %v2712_v9  ;;  %2357 = vst [vmem:[%s3940_s18 + $0x130] sm:$0xff] %v2744_v10 }
 0x1bf   : > { %2356 = vst [vmem:[%s3940_s18 + $0x128] sm:$0xff] %v2713_v13  ;;  %2358 = vst [vmem:[%s3940_s18 + $0x138] sm:$0xff] %v2745_v14 }
 0x1c1   : > { %v1951_v15 = vpop.f32.mrb[20].mxu0  ;;  %v2290_v16 = vpop.f32.mrb[20].mxu1 }
 0x1c2   : > { %v2714_v17 = vadd.f32 %v1951_v15, %v3929_v55  ;;  %v2746_v18 = vadd.f32 %v2290_v16, %v3931_v56  ;;  %v1953_v19 = vpop.f32.mrb[21].mxu0  ;;  %v2292_v20 = vpop.f32.mrb[21].mxu1 }
 0x1c3   : > { %v2715_v21 = vadd.f32 %v1953_v19, %v3933_v57  ;;  %v2747_v22 = vadd.f32 %v2292_v20, %v3935_v58  ;;  %v1955_v23 = vpop.f32.mrb[22].mxu0  ;;  %v2294_v24 = vpop.f32.mrb[22].mxu1 }
 0x1c4   : > { %2359 = vst [vmem:[%s3940_s18 + $0x140] sm:$0xff] %v2714_v17  ;;  %2361 = vst [vmem:[%s3940_s18 + $0x150] sm:$0xff] %v2746_v18  ;;  %v2716_v25 = vadd.f32 %v1955_v23, %v3929_v55  ;;  %v2748_v26 = vadd.f32 %v2294_v24, %v3931_v56  ;;  %v1957_v27 = vpop.f32.mrb[23].mxu0  ;;  %v2296_v28 = vpop.f32.mrb[23].mxu1 }
 0x1c5   : > { %2360 = vst [vmem:[%s3940_s18 + $0x148] sm:$0xff] %v2715_v21  ;;  %2362 = vst [vmem:[%s3940_s18 + $0x158] sm:$0xff] %v2747_v22  ;;  %v2717_v29 = vadd.f32 %v1957_v27, %v3933_v57  ;;  %v2749_v30 = vadd.f32 %v2296_v28, %v3935_v58 }
 0x1c6   : > { %2363 = vst [vmem:[%s3940_s18 + $0x160] sm:$0xff] %v2716_v25  ;;  %2365 = vst [vmem:[%s3940_s18 + $0x170] sm:$0xff] %v2748_v26 }
 0x1c7   : > { %2364 = vst [vmem:[%s3940_s18 + $0x168] sm:$0xff] %v2717_v29  ;;  %2366 = vst [vmem:[%s3940_s18 + $0x178] sm:$0xff] %v2749_v30 }
 0x1c9   : > { %v1961_v31 = vpop.f32.mrb[24].mxu0  ;;  %v2300_v32 = vpop.f32.mrb[24].mxu1 }
 0x1ca   : > { %v2718_v33 = vadd.f32 %v1961_v31, %v3929_v55  ;;  %v2750_v34 = vadd.f32 %v2300_v32, %v3931_v56  ;;  %v1963_v35 = vpop.f32.mrb[25].mxu0  ;;  %v2302_v36 = vpop.f32.mrb[25].mxu1 }
 0x1cb   : > { %v2719_v37 = vadd.f32 %v1963_v35, %v3933_v57  ;;  %v2751_v38 = vadd.f32 %v2302_v36, %v3935_v58  ;;  %v1965_v39 = vpop.f32.mrb[26].mxu0  ;;  %v2304_v40 = vpop.f32.mrb[26].mxu1 }
 0x1cc   : > { %2367 = vst [vmem:[%s3940_s18 + $0x180] sm:$0xff] %v2718_v33  ;;  %2369 = vst [vmem:[%s3940_s18 + $0x190] sm:$0xff] %v2750_v34  ;;  %v2720_v41 = vadd.f32 %v1965_v39, %v3929_v55  ;;  %v2752_v42 = vadd.f32 %v2304_v40, %v3931_v56  ;;  %v1967_v43 = vpop.f32.mrb[27].mxu0  ;;  %v2306_v44 = vpop.f32.mrb[27].mxu1 }
 0x1cd   : > { %2368 = vst [vmem:[%s3940_s18 + $0x188] sm:$0xff] %v2719_v37  ;;  %2370 = vst [vmem:[%s3940_s18 + $0x198] sm:$0xff] %v2751_v38  ;;  %v2721_v45 = vadd.f32 %v1967_v43, %v3933_v57  ;;  %v2753_v46 = vadd.f32 %v2306_v44, %v3935_v58 }
 0x1ce   : > { %2371 = vst [vmem:[%s3940_s18 + $0x1a0] sm:$0xff] %v2720_v41  ;;  %2373 = vst [vmem:[%s3940_s18 + $0x1b0] sm:$0xff] %v2752_v42 }
 0x1cf   : > { %2372 = vst [vmem:[%s3940_s18 + $0x1a8] sm:$0xff] %v2721_v45  ;;  %2374 = vst [vmem:[%s3940_s18 + $0x1b8] sm:$0xff] %v2753_v46 }
 0x1d1   : > { %v1971_v47 = vpop.f32.mrb[28].mxu0  ;;  %v2310_v48 = vpop.f32.mrb[28].mxu1 }
 0x1d2   : > { %v2722_v49 = vadd.f32 %v1971_v47, %v3929_v55  ;;  %v2754_v50 = vadd.f32 %v2310_v48, %v3931_v56  ;;  %v1973_v51 = vpop.f32.mrb[29].mxu0  ;;  %v2312_v52 = vpop.f32.mrb[29].mxu1 }
 0x1d3   : > { %v2723_v53 = vadd.f32 %v1973_v51, %v3933_v57  ;;  %v2755_v54 = vadd.f32 %v2312_v52, %v3935_v58  ;;  %v1975_v59 = vpop.f32.mrb[30].mxu0  ;;  %v2314_v60 = vpop.f32.mrb[30].mxu1 }
 0x1d4   : > { %2375 = vst [vmem:[%s3940_s18 + $0x1c0] sm:$0xff] %v2722_v49  ;;  %2377 = vst [vmem:[%s3940_s18 + $0x1d0] sm:$0xff] %v2754_v50  ;;  %v2724_v61 = vadd.f32 %v1975_v59, %v3929_v55  ;;  %v2756_v62 = vadd.f32 %v2314_v60, %v3931_v56  ;;  %v1977_v63 = vpop.f32.mrb[31].mxu0  ;;  %v2316_v0 = vpop.f32.mrb[31].mxu1 }
 0x1d5   : > { %2376 = vst [vmem:[%s3940_s18 + $0x1c8] sm:$0xff] %v2723_v53  ;;  %2378 = vst [vmem:[%s3940_s18 + $0x1d8] sm:$0xff] %v2755_v54  ;;  %v2725_v1 = vadd.f32 %v1977_v63, %v3933_v57  ;;  %v2757_v2 = vadd.f32 %v2316_v0, %v3935_v58 }
 0x1d6   : > { %2379 = vst [vmem:[%s3940_s18 + $0x1e0] sm:$0xff] %v2724_v61  ;;  %2381 = vst [vmem:[%s3940_s18 + $0x1f0] sm:$0xff] %v2756_v62 }
 0x1d7   : > { %2380 = vst [vmem:[%s3940_s18 + $0x1e8] sm:$0xff] %v2725_v1  ;;  %2382 = vst [vmem:[%s3940_s18 + $0x1f8] sm:$0xff] %v2757_v2 }
 0x1d8 PF: > { %s13_s12 = sadd.s32 1, %s3261_s12  }
 0x1d9   : > { %p10_p4 = scmp.ge.s32.totalorder %s13_s12, 6  }
 0x1db   :  { %12 = sbr.rel (!%p10_p4) target bundleno = 1 (0x1), region = 62 }

</bundles_post_ra>
